<compile_context>
chip_gen: v7x
topology: tpu7x:2x2x1
jax: 0.10.0
libtpu: 0.0.40
codegen_flags: <defaults>
</compile_context>

<pallas_src>
import functools

import jax
import jax.numpy as jnp
from jax.experimental import pallas as pl
from jax.experimental.pallas import tpu as pltpu

HIDDEN = 256
LANE = 128
SUBLANE = 8


def _round_up(x, m):
    return ((x + m - 1) // m) * m


def _actor_kernel(max_action,
                  x_ref, w1_ref, b1_ref, w2_ref, b2_ref, w3_ref, b3_ref,
                  out_ref):
    """Fused 3-layer MLP on one batch tile.

    x_ref  : [TB, S_pad]  bf16
    w*_ref : bf16 weights (padded), b*_ref : f32 biases (padded)
    out_ref: [TB, A_pad]  f32
    """
    x = x_ref[...]                          # bf16 [TB, S_pad]
    b1 = b1_ref[...]                        # f32  [1, 256]
    b2 = b2_ref[...]                        # f32  [1, 256]
    b3 = b3_ref[...]                        # f32  [1, A_pad]

    # Layer 1: bf16 x bf16 -> f32 accumulate on MXU.
    h1 = jnp.dot(x, w1_ref[...], preferred_element_type=jnp.float32)
    h1 = jnp.maximum(h1 + b1, 0.0)          # f32 ReLU on VPU

    # Layer 2.
    h2 = jnp.dot(h1.astype(jnp.bfloat16), w2_ref[...],
                 preferred_element_type=jnp.float32)
    h2 = jnp.maximum(h2 + b2, 0.0)

    # Layer 3 + tanh (EUP) + static max_action scale.
    h3 = jnp.dot(h2.astype(jnp.bfloat16), w3_ref[...],
                 preferred_element_type=jnp.float32)
    out_ref[...] = (max_action * jnp.tanh(h3 + b3)).astype(out_ref.dtype)


def init_actor_params(key, state_dim, action_dim, hidden=HIDDEN):
    """Deterministic init mirroring torch.nn.Linear's U(-1/sqrt(fan_in), +)."""
    ks = jax.random.split(key, 6)

    def linear(kw, kb, fan_in, fan_out):
        bound = 1.0 / jnp.sqrt(jnp.float32(fan_in))
        w = jax.random.uniform(kw, (fan_in, fan_out), jnp.float32, -bound, bound)
        b = jax.random.uniform(kb, (1, fan_out), jnp.float32, -bound, bound)
        return w, b

    w1, b1 = linear(ks[0], ks[1], state_dim, hidden)
    w2, b2 = linear(ks[2], ks[3], hidden, hidden)
    w3, b3 = linear(ks[4], ks[5], hidden, action_dim)
    return {"w1": w1, "b1": b1, "w2": w2, "b2": b2, "w3": w3, "b3": b3}


def prepare_actor_params(params):
    """One-time padding + bf16 cast of the weights for the Pallas kernel.

    - w1 rows padded so state_dim is a multiple of 128 (zero rows).
    - w3/b3 columns padded so action_dim is a multiple of 128 (zero cols),
      giving lane-dense unmasked output stores.
    - Weights stored in bf16 (matmul operands); biases kept f32.
    """
    S, H = params["w1"].shape
    A = params["w3"].shape[1]
    S_pad = _round_up(S, LANE)
    A_pad = _round_up(A, LANE)

    w1 = jnp.zeros((S_pad, H), jnp.bfloat16)
    w1 = w1.at[:S, :].set(params["w1"].astype(jnp.bfloat16))
    w2 = params["w2"].astype(jnp.bfloat16)
    w3 = jnp.zeros((H, A_pad), jnp.bfloat16)
    w3 = w3.at[:, :A].set(params["w3"].astype(jnp.bfloat16))

    b1 = params["b1"].astype(jnp.float32)
    b2 = params["b2"].astype(jnp.float32)
    b3 = jnp.zeros((1, A_pad), jnp.float32)
    b3 = b3.at[:, :A].set(params["b3"].astype(jnp.float32))

    return {"w1": w1, "b1": b1, "w2": w2, "b2": b2, "w3": w3, "b3": b3,
            "state_dim": S, "action_dim": A}


def actor_forward(state, prepared, max_action, batch_tile=256):
    """Run the Actor forward pass as one batch-tiled Pallas TPU kernel.

    state    : [B, state_dim] float32
    prepared : output of prepare_actor_params
    """
    B, S = state.shape
    S_pad, H = prepared["w1"].shape
    A_pad = prepared["w3"].shape[1]
    action_dim = prepared["action_dim"]

    # Batch tile: multiple of 8 (f32 sublane), capped at `batch_tile` so each
    # grid step's VMEM footprint stays small on all generations (v7x: 64 MiB).
    B8 = _round_up(B, SUBLANE)
    TB = min(_round_up(batch_tile, SUBLANE), B8)
    B_pad = _round_up(B, TB)

    # Pad + cast the input once in the wrapper (bf16 halves activation DMA).
    x = jnp.zeros((B_pad, S_pad), jnp.bfloat16)
    x = x.at[:B, :S].set(state.astype(jnp.bfloat16))

    grid = (B_pad // TB,)
    kernel = functools.partial(_actor_kernel, float(max_action))

    # Weights/biases: constant index_map -> resident across batch grid steps.
    resident = lambda i: (0, 0)
    in_specs = [
        pl.BlockSpec((TB, S_pad), lambda i: (i, 0)),   # x      (tiled on batch)
        pl.BlockSpec((S_pad, H), resident),            # w1
        pl.BlockSpec((1, H), resident),                # b1
        pl.BlockSpec((H, H), resident),                # w2
        pl.BlockSpec((1, H), resident),                # b2
        pl.BlockSpec((H, A_pad), resident),            # w3
        pl.BlockSpec((1, A_pad), resident),            # b3
    ]
    out_spec = pl.BlockSpec((TB, A_pad), lambda i: (i, 0))

    out_padded = pl.pallas_call(
        kernel,
        out_shape=jax.ShapeDtypeStruct((B_pad, A_pad), jnp.float32),
        grid=grid,
        in_specs=in_specs,
        out_specs=out_spec,
        compiler_params=pltpu.CompilerParams(
            dimension_semantics=("parallel",)),
    )(x, prepared["w1"], prepared["b1"], prepared["w2"], prepared["b2"],
      prepared["w3"], prepared["b3"])

    return out_padded[:B, :action_dim]


def actor_reference(state, params, max_action):
    """Pure-JAX f32 reference for correctness checking."""
    a = jnp.maximum(state @ params["w1"] + params["b1"], 0.0)
    a = jnp.maximum(a @ params["w2"] + params["b2"], 0.0)
    return max_action * jnp.tanh(a @ params["w3"] + params["b3"])


if __name__ == "__main__":
    key = jax.random.PRNGKey(0)
    k_state, k_params = jax.random.split(key)

    batch = 2
    state_dim = 16
    action_dim = 4
    max_action = 1.0

    state = jax.random.normal(k_state, (batch, state_dim), jnp.float32)
    params = init_actor_params(k_params, state_dim, action_dim)
    prepared = prepare_actor_params(params)

    out = actor_forward(state, prepared, max_action)
    out = jax.block_until_ready(out)

    ref = actor_reference(state, params, max_action)
    assert out.shape == (batch, action_dim), out.shape
    # bf16 matmul operands (f32 accumulate) => loosened tolerance vs f32 ref.
    assert jnp.allclose(out, ref, atol=3e-2, rtol=3e-2), (
        "mismatch vs reference", jnp.max(jnp.abs(out - ref)))

    print("KERNEL_OK")
</pallas_src>

<mosaic_0001>
module attributes {stable_mosaic.version = 11 : i64} {
  func.func @_actor_kernel(%arg0: i32, %arg1: memref<8x128xbf16, #tpu.memory_space<vmem>>, %arg2: memref<128x256xbf16, #tpu.memory_space<vmem>>, %arg3: memref<1x256xf32, #tpu.memory_space<vmem>>, %arg4: memref<256x256xbf16, #tpu.memory_space<vmem>>, %arg5: memref<1x256xf32, #tpu.memory_space<vmem>>, %arg6: memref<256x128xbf16, #tpu.memory_space<vmem>>, %arg7: memref<1x128xf32, #tpu.memory_space<vmem>>, %arg8: memref<8x128xf32, #tpu.memory_space<vmem>>) attributes {dimension_semantics = [#tpu.dimension_semantics<parallel>], iteration_bounds = array<i64: 1>, scalar_prefetch = 0 : i64, scratch_operands = 0 : i64, tpu.core_type = #tpu.core_type<tc>, window_params = [{transform_indices = @transform_0, window_bounds = array<i64: 8, 128>}, {pipeline_mode = #tpu.pipeline_mode<synchronous>, transform_indices = @transform_1, window_bounds = array<i64: 128, 256>}, {pipeline_mode = #tpu.pipeline_mode<synchronous>, transform_indices = @transform_2, window_bounds = array<i64: 1, 256>}, {pipeline_mode = #tpu.pipeline_mode<synchronous>, transform_indices = @transform_3, window_bounds = array<i64: 256, 256>}, {pipeline_mode = #tpu.pipeline_mode<synchronous>, transform_indices = @transform_4, window_bounds = array<i64: 1, 256>}, {pipeline_mode = #tpu.pipeline_mode<synchronous>, transform_indices = @transform_5, window_bounds = array<i64: 256, 128>}, {pipeline_mode = #tpu.pipeline_mode<synchronous>, transform_indices = @transform_6, window_bounds = array<i64: 1, 128>}, {transform_indices = @transform_7, window_bounds = array<i64: 8, 128>}]} {
    %c0 = arith.constant 0 : index
    %c0_0 = arith.constant 0 : index
    %0 = vector.load %arg1[%c0, %c0_0] : memref<8x128xbf16, #tpu.memory_space<vmem>>, vector<8x128xbf16>
    %c0_1 = arith.constant 0 : index
    %c0_2 = arith.constant 0 : index
    %1 = vector.load %arg3[%c0_1, %c0_2] : memref<1x256xf32, #tpu.memory_space<vmem>>, vector<1x256xf32>
    %c0_3 = arith.constant 0 : index
    %c0_4 = arith.constant 0 : index
    %2 = vector.load %arg5[%c0_3, %c0_4] : memref<1x256xf32, #tpu.memory_space<vmem>>, vector<1x256xf32>
    %c0_5 = arith.constant 0 : index
    %c0_6 = arith.constant 0 : index
    %3 = vector.load %arg7[%c0_5, %c0_6] : memref<1x128xf32, #tpu.memory_space<vmem>>, vector<1x128xf32>
    %c0_7 = arith.constant 0 : index
    %c0_8 = arith.constant 0 : index
    %4 = vector.load %arg2[%c0_7, %c0_8] : memref<128x256xbf16, #tpu.memory_space<vmem>>, vector<128x256xbf16>
    %cst = arith.constant dense<0.000000e+00> : vector<8x256xf32>
    %5 = tpu.matmul %0, %4, %cst {dimension_numbers = #tpu.dot_dimension_numbers<[1], [0], [0], [1], [0, 0, 1, 1], [], []>} : vector<8x128xbf16>, vector<128x256xbf16>, vector<8x256xf32> -> vector<8x256xf32>
    %6 = vector.broadcast %1 : vector<1x256xf32> to vector<8x256xf32>
    %7 = arith.addf %5, %6 : vector<8x256xf32>
    %cst_9 = arith.constant 0.000000e+00 : f32
    %8 = vector.broadcast %cst_9 : f32 to vector<8x256xf32>
    %9 = arith.maximumf %7, %8 : vector<8x256xf32>
    %10 = arith.truncf %9 : vector<8x256xf32> to vector<8x256xbf16>
    %c0_10 = arith.constant 0 : index
    %c0_11 = arith.constant 0 : index
    %11 = vector.load %arg4[%c0_10, %c0_11] : memref<256x256xbf16, #tpu.memory_space<vmem>>, vector<256x256xbf16>
    %cst_12 = arith.constant dense<0.000000e+00> : vector<8x256xf32>
    %12 = tpu.matmul %10, %11, %cst_12 {dimension_numbers = #tpu.dot_dimension_numbers<[1], [0], [0], [1], [0, 0, 1, 1], [], []>} : vector<8x256xbf16>, vector<256x256xbf16>, vector<8x256xf32> -> vector<8x256xf32>
    %13 = vector.broadcast %2 : vector<1x256xf32> to vector<8x256xf32>
    %14 = arith.addf %12, %13 : vector<8x256xf32>
    %cst_13 = arith.constant 0.000000e+00 : f32
    %15 = vector.broadcast %cst_13 : f32 to vector<8x256xf32>
    %16 = arith.maximumf %14, %15 : vector<8x256xf32>
    %17 = arith.truncf %16 : vector<8x256xf32> to vector<8x256xbf16>
    %c0_14 = arith.constant 0 : index
    %c0_15 = arith.constant 0 : index
    %18 = vector.load %arg6[%c0_14, %c0_15] : memref<256x128xbf16, #tpu.memory_space<vmem>>, vector<256x128xbf16>
    %cst_16 = arith.constant dense<0.000000e+00> : vector<8x128xf32>
    %19 = tpu.matmul %17, %18, %cst_16 {dimension_numbers = #tpu.dot_dimension_numbers<[1], [0], [0], [1], [0, 0, 1, 1], [], []>} : vector<8x256xbf16>, vector<256x128xbf16>, vector<8x128xf32> -> vector<8x128xf32>
    %20 = vector.broadcast %3 : vector<1x128xf32> to vector<8x128xf32>
    %21 = arith.addf %19, %20 : vector<8x128xf32>
    %22 = math.tanh %21 : vector<8x128xf32>
    %cst_17 = arith.constant 1.000000e+00 : f32
    %23 = vector.broadcast %cst_17 : f32 to vector<8x128xf32>
    %24 = arith.mulf %23, %22 : vector<8x128xf32>
    %c0_18 = arith.constant 0 : index
    %c0_19 = arith.constant 0 : index
    %25 = vector.load %arg8[%c0_18, %c0_19] : memref<8x128xf32, #tpu.memory_space<vmem>>, vector<8x128xf32>
    tpu.vector_store %arg8[%c0_18, %c0_19], %24 {strides = array<i32>} : memref<8x128xf32, #tpu.memory_space<vmem>>, vector<8x128xf32>,
    return
  }
  func.func @transform_0(%arg0: i32) -> (i32, i32) {
    %c0_i32 = arith.constant 0 : i32
    %c0_i32_0 = arith.constant 0 : i32
    return %arg0, %c0_i32 : i32, i32
  }
  func.func @transform_1(%arg0: i32) -> (i32, i32) {
    %c0_i32 = arith.constant 0 : i32
    %c0_i32_0 = arith.constant 0 : i32
    %c0_i32_1 = arith.constant 0 : i32
    return %c0_i32, %c0_i32_0 : i32, i32
  }
  func.func @transform_2(%arg0: i32) -> (i32, i32) {
    %c0_i32 = arith.constant 0 : i32
    %c0_i32_0 = arith.constant 0 : i32
    %c0_i32_1 = arith.constant 0 : i32
    return %c0_i32, %c0_i32_0 : i32, i32
  }
  func.func @transform_3(%arg0: i32) -> (i32, i32) {
    %c0_i32 = arith.constant 0 : i32
    %c0_i32_0 = arith.constant 0 : i32
    %c0_i32_1 = arith.constant 0 : i32
    return %c0_i32, %c0_i32_0 : i32, i32
  }
  func.func @transform_4(%arg0: i32) -> (i32, i32) {
    %c0_i32 = arith.constant 0 : i32
    %c0_i32_0 = arith.constant 0 : i32
    %c0_i32_1 = arith.constant 0 : i32
    return %c0_i32, %c0_i32_0 : i32, i32
  }
  func.func @transform_5(%arg0: i32) -> (i32, i32) {
    %c0_i32 = arith.constant 0 : i32
    %c0_i32_0 = arith.constant 0 : i32
    %c0_i32_1 = arith.constant 0 : i32
    return %c0_i32, %c0_i32_0 : i32, i32
  }
  func.func @transform_6(%arg0: i32) -> (i32, i32) {
    %c0_i32 = arith.constant 0 : i32
    %c0_i32_0 = arith.constant 0 : i32
    %c0_i32_1 = arith.constant 0 : i32
    return %c0_i32, %c0_i32_0 : i32, i32
  }
  func.func @transform_7(%arg0: i32) -> (i32, i32) {
    %c0_i32 = arith.constant 0 : i32
    %c0_i32_0 = arith.constant 0 : i32
    return %arg0, %c0_i32 : i32, i32
  }
}

</mosaic_0001>

<bundles_post_ra>
// kernel: tpu_custom_call.1
= control target key start
LH: loop header
LB: loop body
LE: loop exit
PB: predicated region body
PF: predicated region fallthrough
CT: control target
= control target key end

     0   :  { %12 = vsyncpa [#allocation3], 0  ;;  %s1108_s0 = inlined_call_operand.hbm [shape: bf16[8,128], index: 0, kind: input, shape index: {}]   ;;  %s1109_s1 = inlined_call_operand.hbm [shape: bf16[128,256], index: 1, kind: input, shape index: {}]   ;;  %s1110_s2 = inlined_call_operand.vmem [shape: f32[1,256], index: 2, kind: input, shape index: {}]   ;;  %s1111_s3 = inlined_call_operand.hbm [shape: bf16[256,256], index: 3, kind: input, shape index: {}]   ;;  %s1112_s4 = inlined_call_operand.vmem [shape: f32[1,256], index: 4, kind: input, shape index: {}]   ;;  %s1113_s5 = inlined_call_operand.hbm [shape: bf16[256,128], index: 5, kind: input, shape index: {}]   ;;  %s1114_s6 = inlined_call_operand.vmem [shape: f32[1,128], index: 6, kind: input, shape index: {}]   ;;  %s1115_s7 = inlined_call_operand.hbm [shape: f32[8,128], index: 7, kind: output, shape index: {}]  }
   0x1   :  { %13 = vsyncpa [#allocation6], 0 }
   0x2   :  { %14 = vsyncpa [#allocation9], 0 }
   0x3   :  { %15 = vsyncpa [#allocation4], 0  ;;  %s983_s24 = smov [#allocation5]   ;;  %s865_s28 = scalar_lea.hbm %s1109_s1, 2048 }
   0x4   :  { %s31_s25 = sshll.u32 %s983_s24, 4  ;;  %p866_p0 = scmp.ne.s32.totalorder %s1109_s1, %s865_s28  ;;  %s32_s25 = int_to_ptr.vmem [resolvable:$true] %s31_s25 }
   0x5   :  { %p869_p1 = scmp.lt.u32.totalorder %s865_s28, %s1109_s1 }
   0x7   :  { %p871_p2 = pnand %p869_p1, %p866_p0 }
   0x9   :  { %874 = shalt.err (!%p871_p2)
}
   0xa   :  { %s875_s10 = scalar_lea.vmem %s32_s25, 2048  ;;  %p880_p4 = scmp.lt.s32.totalorder %s32_s25, %s32_s25 }
   0xb   :  { %p876_p3 = scmp.ne.s32.totalorder %s32_s25, %s875_s10  ;;  %p881_p5 = scmp.lt.s32.totalorder %s875_s10, %s875_s10 }
   0xd   :  { %p882_p6 = por %p881_p5, %p880_p4 }
   0xf   :  { %p883_p7 = pnand %p882_p6, %p876_p3 }
  0x11   :  { %886 = shalt.err (!%p883_p7)
}
  0x12   :  { %s984_s11 = smov 128   ;;  %s985_s12 = smov 8  }
  0x13   :  { %37 = dma.hbm_to_vmem [thread:$0]  %s1109_s1, 2048, %s32_s25, [#allocation6], %s984_s11, %s984_s11, %s985_s12  }
  0x14   :  { %s986_s15 = smov [#allocation2]   ;;  %s987_s17 = smov [#allocation7]  }
  0x15   :  { %s22_s16 = sshll.u32 %s986_s15, 4  ;;  %s45_s18 = sshll.u32 %s987_s17, 4  ;;  %s23_s16 = int_to_ptr.vmem [resolvable:$true] %s22_s16  ;;  %s46_s18 = int_to_ptr.vmem [resolvable:$true] %s45_s18 }
  0x16   :  { %s887_s21 = scalar_lea.hbm %s1108_s0, 64 }
  0x17   :  { %p888_p8 = scmp.ne.s32.totalorder %s1108_s0, %s887_s21  ;;  %p891_p9 = scmp.lt.u32.totalorder %s887_s21, %s1108_s0 }
  0x19   :  { %p893_p10 = pnand %p891_p9, %p888_p8 }
  0x1b   :  { %896 = shalt.err (!%p893_p10)
}
  0x1c   :  { %s897_s1 = scalar_lea.vmem %s23_s16, 64  ;;  %p902_p12 = scmp.lt.s32.totalorder %s23_s16, %s23_s16 }
  0x1d   :  { %p898_p11 = scmp.ne.s32.totalorder %s23_s16, %s897_s1  ;;  %p903_p13 = scmp.lt.s32.totalorder %s897_s1, %s897_s1 }
  0x1f   :  { %p904_p0 = por %p903_p13, %p902_p12 }
  0x21   :  { %p905_p1 = pnand %p904_p0, %p898_p11 }
  0x23   :  { %908 = shalt.err (!%p905_p1)
}
  0x24   :  { %25 = dma.hbm_to_vmem [thread:$0]  %s1108_s0, 64, %s23_s16, [#allocation3]  }
  0x25   :  { %s909_s30 = scalar_lea.hbm %s1111_s3, 4096 }
  0x26   :  { %p910_p2 = scmp.ne.s32.totalorder %s1111_s3, %s909_s30  ;;  %p913_p3 = scmp.lt.u32.totalorder %s909_s30, %s1111_s3 }
  0x28   :  { %p915_p4 = pnand %p913_p3, %p910_p2 }
  0x2a   :  { %918 = shalt.err (!%p915_p4)
}
  0x2b   :  { %s919_s14 = scalar_lea.vmem %s46_s18, 4096  ;;  %p924_p6 = scmp.lt.s32.totalorder %s46_s18, %s46_s18 }
  0x2c   :  { %p920_p5 = scmp.ne.s32.totalorder %s46_s18, %s919_s14  ;;  %p925_p7 = scmp.lt.s32.totalorder %s919_s14, %s919_s14 }
  0x2e   :  { %p926_p8 = por %p925_p7, %p924_p6 }
  0x30   :  { %p927_p9 = pnand %p926_p8, %p920_p5 }
  0x32   :  { %930 = shalt.err (!%p927_p9)
}
  0x33   :  { %51 = dma.hbm_to_vmem [thread:$0]  %s1111_s3, 4096, %s46_s18, [#allocation6], %s984_s11, %s984_s11, %s985_s12  }
  0x34   :  { %s988_s16 = smov [#allocation8]   ;;  %s931_s21 = scalar_lea.hbm %s1113_s5, 2048 }
  0x35   :  { %s59_s17 = sshll.u32 %s988_s16, 4  ;;  %p932_p10 = scmp.ne.s32.totalorder %s1113_s5, %s931_s21  ;;  %s60_s17 = int_to_ptr.vmem [resolvable:$true] %s59_s17 }
  0x36   :  { %p935_p11 = scmp.lt.u32.totalorder %s931_s21, %s1113_s5 }
  0x38   :  { %p937_p12 = pnand %p935_p11, %p932_p10 }
  0x3a   :  { %940 = shalt.err (!%p937_p12)
}
  0x3b   :  { %s941_s1 = scalar_lea.vmem %s60_s17, 2048  ;;  %p946_p0 = scmp.lt.s32.totalorder %s60_s17, %s60_s17 }
  0x3c   :  { %p942_p13 = scmp.ne.s32.totalorder %s60_s17, %s941_s1  ;;  %p947_p1 = scmp.lt.s32.totalorder %s941_s1, %s941_s1 }
  0x3e   :  { %p948_p2 = por %p947_p1, %p946_p0 }
  0x40   :  { %p949_p3 = pnand %p948_p2, %p942_p13 }
  0x42   :  { %952 = shalt.err (!%p949_p3)
}
  0x43   :  { %s989_s3 = smov 64   ;;  %s990_s11 = smov 4  }
  0x44   :  { %65 = dma.hbm_to_vmem [thread:$0]  %s1113_s5, 2048, %s60_s17, [#allocation9], %s989_s3, %s989_s3, %s990_s11  }
  0x45   :  { %975 = dma.done.wait [#allocation3], 64  }
  0x46   :  { %976 = vsyncadd [#allocation3], 4294967232 }
  0x47   :  { %977 = dma.done.wait [#allocation6], 6144  }
  0x48   :  { %978 = vsyncadd [#allocation6], 4294961152 }
  0x49   :  { %979 = dma.done.wait [#allocation9], 2048  }
  0x4a   :  { %980 = vsyncadd [#allocation9], 4294965248  ;;  %v991_v0 = vmov 0   ;;  %v775_v1 = vld [vmem:[#allocation5 + $0x4] ss:$8 sps:$4 sm:$0xff]   ;;  %v851_v54 = vld [vmem:[#allocation8 + $0x50] sm:$0xff]   ;;  %v102_v62 = vlaneseq }
  0x4b   :  { %224 = vmatprep.mubr.bf16.mxu0 %v991_v0  ;;  %v777_v2 = vld [vmem:[#allocation5] ss:$8 sps:$4 sm:$0xff]   ;;  %192 = vmatprep.subr.bf16.mxu0 %v775_v1  ;;  %v778_v3 = vld [vmem:[#allocation5 + $0x14] ss:$8 sps:$4 sm:$0xff]   ;;  %v780_v4 = vld [vmem:[#allocation5 + $0x10] ss:$8 sps:$4 sm:$0xff]  }
  0x4c   :  { %193 = vmatpush1.bf16.msra.mxu0 %v777_v2  ;;  %v781_v5 = vld [vmem:[#allocation5 + $0x24] ss:$8 sps:$4 sm:$0xff]   ;;  %v783_v6 = vld [vmem:[#allocation5 + $0x20] ss:$8 sps:$4 sm:$0xff]   ;;  %v784_v7 = vld [vmem:[#allocation5 + $0x34] ss:$8 sps:$4 sm:$0xff]  }
  0x4d   :  { %194 = vmatprep.subr.bf16.mxu0 %v778_v3  ;;  %v786_v8 = vld [vmem:[#allocation5 + $0x30] ss:$8 sps:$4 sm:$0xff]   ;;  %v787_v9 = vld [vmem:[#allocation5 + $0x44] ss:$8 sps:$4 sm:$0xff]   ;;  %v801_v11 = vld [vmem:[#allocation7] ss:$8 sps:$4 sm:$0xff]  }
  0x4e   :  { %v799_v10 = vld [vmem:[#allocation7 + $0x4] ss:$8 sps:$4 sm:$0xff]   ;;  %v802_v12 = vld [vmem:[#allocation7 + $0x14] ss:$8 sps:$4 sm:$0xff]   ;;  %v789_v13 = vld [vmem:[#allocation5 + $0x40] ss:$8 sps:$4 sm:$0xff]  }
  0x4f   :  { %440 = vmatprep.subr.bf16.mxu1 %v799_v10  ;;  %v804_v14 = vld [vmem:[#allocation7 + $0x10] ss:$8 sps:$4 sm:$0xff]   ;;  %v805_v15 = vld [vmem:[#allocation7 + $0x24] ss:$8 sps:$4 sm:$0xff]   ;;  %v790_v16 = vld [vmem:[#allocation5 + $0x54] ss:$8 sps:$4 sm:$0xff]  }
  0x50   :  { %195 = vmatpush1.bf16.msra.mxu0 %v780_v4  ;;  %441 = vmatpush1.bf16.msra.mxu1 %v801_v11  ;;  %v792_v17 = vld [vmem:[#allocation5 + $0x50] ss:$8 sps:$4 sm:$0xff]   ;;  %v807_v18 = vld [vmem:[#allocation7 + $0x20] ss:$8 sps:$4 sm:$0xff]   ;;  %v808_v19 = vld [vmem:[#allocation7 + $0x34] ss:$8 sps:$4 sm:$0xff]  }
  0x51   :  { %196 = vmatprep.subr.bf16.mxu0 %v781_v5  ;;  %442 = vmatprep.subr.bf16.mxu1 %v802_v12  ;;  %v793_v20 = vld [vmem:[#allocation5 + $0x64] ss:$8 sps:$4 sm:$0xff]   ;;  %v795_v21 = vld [vmem:[#allocation5 + $0x60] ss:$8 sps:$4 sm:$0xff]   ;;  %v810_v22 = vld [vmem:[#allocation7 + $0x30] ss:$8 sps:$4 sm:$0xff]  }
  0x52   :  { %v811_v23 = vld [vmem:[#allocation7 + $0x44] ss:$8 sps:$4 sm:$0xff]   ;;  %v796_v24 = vld [vmem:[#allocation5 + $0x74] ss:$8 sps:$4 sm:$0xff]   ;;  %v798_v25 = vld [vmem:[#allocation5 + $0x70] ss:$8 sps:$4 sm:$0xff]  }
  0x53   :  { %v813_v26 = vld [vmem:[#allocation7 + $0x40] ss:$8 sps:$4 sm:$0xff]   ;;  %v814_v27 = vld [vmem:[#allocation7 + $0x54] ss:$8 sps:$4 sm:$0xff]   ;;  %v816_v29 = vld [vmem:[#allocation7 + $0x50] ss:$8 sps:$4 sm:$0xff]  }
  0x54   :  { %197 = vmatpush1.bf16.msra.mxu0 %v783_v6  ;;  %443 = vmatpush1.bf16.msra.mxu1 %v804_v14  ;;  %v81_v28 = vld [vmem:[#allocation2] sm:$0xf]  ;;  %v817_v30 = vld [vmem:[#allocation7 + $0x64] ss:$8 sps:$4 sm:$0xff]   ;;  %v819_v31 = vld [vmem:[#allocation7 + $0x60] ss:$8 sps:$4 sm:$0xff]  }
  0x55   :  { %198 = vmatprep.subr.bf16.mxu0 %v784_v7  ;;  %444 = vmatprep.subr.bf16.mxu1 %v805_v15  ;;  %v820_v32 = vld [vmem:[#allocation7 + $0x74] ss:$8 sps:$4 sm:$0xff]   ;;  %v822_v33 = vld [vmem:[#allocation7 + $0x70] ss:$8 sps:$4 sm:$0xff]   ;;  %v823_v34 = vld [vmem:[#allocation7 + $0x84] ss:$8 sps:$4 sm:$0xff]  }
  0x56   :  { %v825_v35 = vld [vmem:[#allocation7 + $0x80] ss:$8 sps:$4 sm:$0xff]   ;;  %v826_v36 = vld [vmem:[#allocation7 + $0x94] ss:$8 sps:$4 sm:$0xff]   ;;  %v828_v37 = vld [vmem:[#allocation7 + $0x90] ss:$8 sps:$4 sm:$0xff]  }
  0x57   :  { %v829_v38 = vld [vmem:[#allocation7 + $0xa4] ss:$8 sps:$4 sm:$0xff]   ;;  %v831_v39 = vld [vmem:[#allocation7 + $0xa0] ss:$8 sps:$4 sm:$0xff]   ;;  %v832_v40 = vld [vmem:[#allocation7 + $0xb4] ss:$8 sps:$4 sm:$0xff]  }
  0x58   :  { %199 = vmatpush1.bf16.msra.mxu0 %v786_v8  ;;  %445 = vmatpush1.bf16.msra.mxu1 %v807_v18  ;;  %v834_v41 = vld [vmem:[#allocation7 + $0xb0] ss:$8 sps:$4 sm:$0xff]   ;;  %v835_v42 = vld [vmem:[#allocation7 + $0xc4] ss:$8 sps:$4 sm:$0xff]   ;;  %v837_v43 = vld [vmem:[#allocation7 + $0xc0] ss:$8 sps:$4 sm:$0xff]  }
  0x59   :  { %200 = vmatprep.subr.bf16.mxu0 %v787_v9  ;;  %446 = vmatprep.subr.bf16.mxu1 %v808_v19  ;;  %v838_v44 = vld [vmem:[#allocation7 + $0xd4] ss:$8 sps:$4 sm:$0xff]   ;;  %v840_v45 = vld [vmem:[#allocation7 + $0xd0] ss:$8 sps:$4 sm:$0xff]   ;;  %v841_v46 = vld [vmem:[#allocation7 + $0xe4] ss:$8 sps:$4 sm:$0xff]  }
  0x5a   :  { %v843_v47 = vld [vmem:[#allocation7 + $0xe0] ss:$8 sps:$4 sm:$0xff]   ;;  %v844_v48 = vld [vmem:[#allocation7 + $0xf4] ss:$8 sps:$4 sm:$0xff]   ;;  %v846_v49 = vld [vmem:[#allocation7 + $0xf0] ss:$8 sps:$4 sm:$0xff]  }
  0x5b   :  { %v847_v50 = vld [vmem:[#allocation8 + $0x40] sm:$0xff]   ;;  %v849_v52 = vld [vmem:[#allocation8 + $0x48] sm:$0xff]   ;;  %v852_v55 = vld [vmem:[#allocation8 + $0x10] sm:$0xff]   ;;  %v103_v63 = vshrl.u32 %v102_v62, 7 }
  0x5c   :  { %201 = vmatpush1.bf16.msra.mxu0 %v789_v13  ;;  %447 = vmatpush1.bf16.msra.mxu1 %v810_v22  ;;  %v848_v51 = vld [vmem:[#allocation8] sm:$0xff]   ;;  %v850_v53 = vld [vmem:[#allocation8 + $0x8] sm:$0xff]   ;;  %v853_v56 = vld [vmem:[#allocation8 + $0x58] sm:$0xff]  }
  0x5d   :  { %202 = vmatprep.subr.bf16.mxu0 %v790_v16  ;;  %448 = vmatprep.subr.bf16.mxu1 %v811_v23  ;;  %v854_v57 = vld [vmem:[#allocation8 + $0x18] sm:$0xff]   ;;  %v855_v58 = vld [vmem:[#allocation8 + $0x60] sm:$0xff]   ;;  %v857_v60 = vld [vmem:[#allocation8 + $0x68] sm:$0xff]   ;;  %v104_v0 = vsub.s32 0, %v103_v63  ;;  %v108_v2 = vsub.s32 1, %v103_v63 }
  0x5e   :  { %v856_v59 = vld [vmem:[#allocation8 + $0x20] sm:$0xff]   ;;  %v858_v61 = vld [vmem:[#allocation8 + $0x28] sm:$0xff]   ;;  %v82_v1 = vld [vmem:[%s1110_s2] sm:$0x3] }
  0x5f   :  { %v105_v3 = vrot.slane %v82_v1, %v104_v0  ;;  %v109_v4 = vrot.slane %v82_v1, %v108_v2  ;;  %v859_v15 = vld [vmem:[#allocation8 + $0x70] sm:$0xff]   ;;  %v862_v18 = vld [vmem:[#allocation8 + $0x38] sm:$0xff]  }
  0x60   :  { %203 = vmatpush1.bf16.msra.mxu0 %v792_v17  ;;  %449 = vmatpush1.bf16.msra.mxu1 %v813_v26  ;;  %v860_v16 = vld [vmem:[#allocation8 + $0x30] sm:$0xff]   ;;  %v861_v17 = vld [vmem:[#allocation8 + $0x78] sm:$0xff]  }
  0x61   :  { %204 = vmatprep.subr.bf16.mxu0 %v793_v20  ;;  %450 = vmatprep.subr.bf16.mxu1 %v814_v27  ;;  %v83_v19 = vld [vmem:[%s1112_s4] sm:$0x3]  ;;  %s992_s4 = smov [#allocation10]  }
  0x62   :  { %v273_v20 = vrot.slane %v83_v19, %v104_v0  ;;  %s667_s30 = sshll.u32 %s992_s4, 4  ;;  %s668_s30 = int_to_ptr.vmem [resolvable:$true] %s667_s30 }
  0x63   :  { %s953_s8 = scalar_lea.vmem %s668_s30, 128  ;;  %p958_p5 = scmp.lt.s32.totalorder %s668_s30, %s668_s30 }
  0x64   :  { %205 = vmatpush1.bf16.msra.mxu0 %v795_v21  ;;  %451 = vmatpush1.bf16.msra.mxu1 %v816_v29  ;;  %v277_v21 = vrot.slane %v83_v19, %v108_v2  ;;  %p954_p4 = scmp.ne.s32.totalorder %s668_s30, %s953_s8  ;;  %p959_p6 = scmp.lt.s32.totalorder %s953_s8, %s953_s8 }
  0x65   :  { %206 = vmatprep.subr.bf16.mxu0 %v796_v24  ;;  %452 = vmatprep.subr.bf16.mxu1 %v817_v30 }
  0x66   :  { %p960_p7 = por %p959_p6, %p958_p5 }
  0x68   :  { %207 = vmatpush1.bf16.msra.mxu0 %v798_v25  ;;  %453 = vmatpush1.bf16.msra.mxu1 %v819_v31  ;;  %p961_p8 = pnand %p960_p7, %p954_p4 }
  0x69   :  { %454 = vmatprep.subr.bf16.mxu1 %v820_v32  ;;  %743 = vmatprep.subr.bf16.mxu0 %v847_v50 }
  0x6b   :  { %225 = vmatmul.mubr.bf16.vlgmr.msra.gmra.mrb[0].mxu0 %v81_v28 }
  0x6c   :  { %455 = vmatpush1.bf16.msra.mxu1 %v822_v33  ;;  %744 = vmatpush3.bf16.msra.mxu0 %v848_v51  ;;  %v726_v33 = vld [vmem:[%s1114_s6] ss:$0 sm:$0xff] }
  0x6d   :  { %456 = vmatprep.subr.bf16.mxu1 %v823_v34  ;;  %745 = vmatprep.subr.bf16.mxu0 %v849_v52 }
  0x70   :  { %457 = vmatpush1.bf16.msra.mxu1 %v825_v35  ;;  %746 = vmatpush3.bf16.msra.mxu0 %v850_v53 }
  0x71   :  { %458 = vmatprep.subr.bf16.mxu1 %v826_v36  ;;  %747 = vmatprep.subr.bf16.mxu0 %v851_v54 }
  0x74   :  { %459 = vmatpush1.bf16.msra.mxu1 %v828_v37  ;;  %748 = vmatpush3.bf16.msra.mxu0 %v852_v55 }
  0x75   :  { %460 = vmatprep.subr.bf16.mxu1 %v829_v38  ;;  %749 = vmatprep.subr.bf16.mxu0 %v853_v56 }
  0x78   :  { %461 = vmatpush1.bf16.msra.mxu1 %v831_v39  ;;  %750 = vmatpush3.bf16.msra.mxu0 %v854_v57 }
  0x79   :  { %462 = vmatprep.subr.bf16.mxu1 %v832_v40  ;;  %751 = vmatprep.subr.bf16.mxu0 %v855_v58 }
  0x7c   :  { %463 = vmatpush1.bf16.msra.mxu1 %v834_v41  ;;  %752 = vmatpush3.bf16.msra.mxu0 %v856_v59 }
  0x7d   :  { %464 = vmatprep.subr.bf16.mxu1 %v835_v42  ;;  %753 = vmatprep.subr.bf16.mxu0 %v857_v60 }
  0x80   :  { %465 = vmatpush1.bf16.msra.mxu1 %v837_v43  ;;  %754 = vmatpush3.bf16.msra.mxu0 %v858_v61 }
  0x81   :  { %466 = vmatprep.subr.bf16.mxu1 %v838_v44  ;;  %755 = vmatprep.subr.bf16.mxu0 %v859_v15 }
  0x84   :  { %467 = vmatpush1.bf16.msra.mxu1 %v840_v45  ;;  %756 = vmatpush3.bf16.msra.mxu0 %v860_v16 }
  0x85   :  { %468 = vmatprep.subr.bf16.mxu1 %v841_v46  ;;  %757 = vmatprep.subr.bf16.mxu0 %v861_v17 }
  0x88   :  { %469 = vmatpush1.bf16.msra.mxu1 %v843_v47  ;;  %758 = vmatpush3.bf16.msra.mxu0 %v862_v18 }
  0x89   :  { %470 = vmatprep.subr.bf16.mxu1 %v844_v48 }
  0x8c   :  { %471 = vmatpush1.bf16.msra.mxu1 %v846_v49 }
 0x13e   :  { %v226_v5 = vpop.f32.mrb[0].mxu0 }
 0x13f   :  { %v227_v6 = vadd.f32 %v226_v5, %v105_v3  ;;  %v228_v7 = vpop.f32.mrb[1].mxu0 }
 0x140   :  { %v229_v8 = vadd.f32 %v228_v7, %v109_v4  ;;  %v230_v9 = vpop.f32.mrb[2].mxu0 }
 0x141   :  { %v233_v10 = vmax.f32 %v227_v6, 0.0  ;;  %v231_v11 = vpop.f32.mrb[3].mxu0 }
 0x142   :  { %v234_v12 = vmax.f32 %v229_v8, 0.0 }
 0x143   :  { %v235_v14 = vpack.c.bf16 %v233_v10, %v233_v10 }
 0x144   :  { %v236_v13 = vpack.c.bf16 %v234_v12, %v234_v12 }
 0x146   :  { %472 = vmatprep.mubr.bf16.mxu1 %v236_v13 }
 0x147   :  { %473 = vmatmul.mubr.bf16.vlgmr.msra.gmra.mrb[0].mxu1 %v235_v14 }
 0x21a   :  { %v474_v22 = vpop.f32.mrb[0].mxu1 }
 0x21b   :  { %v475_v23 = vadd.f32 %v474_v22, %v273_v20  ;;  %v476_v24 = vpop.f32.mrb[1].mxu1 }
 0x21c   :  { %v477_v25 = vadd.f32 %v476_v24, %v277_v21  ;;  %v478_v26 = vpop.f32.mrb[2].mxu1 }
 0x21d   :  { %v481_v27 = vmax.f32 %v475_v23, 0.0  ;;  %v479_v28 = vpop.f32.mrb[3].mxu1 }
 0x21e   :  { %v482_v29 = vmax.f32 %v477_v25, 0.0 }
 0x21f   :  { %v483_v31 = vpack.c.bf16 %v481_v27, %v481_v27 }
 0x220   :  { %v484_v30 = vpack.c.bf16 %v482_v29, %v482_v29 }
 0x222   :  { %651 = vmatprep.mubr.bf16.mxu0 %v484_v30 }
 0x223   :  { %652 = vmatmul.mubr.bf16.vlgmr.msra.gmra.mrb[4].mxu0 %v483_v31 }
 0x2f6   :  { %v759_v32 = vpop.f32.mrb[4].mxu0 }
 0x2f7   :  { %v760_v34 = vpop.f32.mrb[5].mxu0 }
 0x2f8   :  { %v761_v35 = vadd.f32 %v760_v34, %v759_v32  ;;  %v762_v36 = vpop.f32.mrb[6].mxu0 }
 0x2f9   :  { %v763_v37 = vpop.f32.mrb[7].mxu0 }
 0x2fa   :  { %v654_v38 = vadd.f32 %v761_v35, %v726_v33 }
 0x2fc   :  { %863 = vtanh.f32 %v654_v38 }
 0x306   :  { %v864_v39 = vpop.eup %863 }
 0x307   :  { %660 = vst [vmem:[#allocation10] sm:$0xff] %v864_v39 }
 0x308   :  { %964 = shalt.err (!%p961_p8)
}
 0x309   :  { %s965_s10 = scalar_lea.hbm %s1115_s7, 128 }
 0x30a   :  { %p966_p9 = scmp.ne.s32.totalorder %s1115_s7, %s965_s10  ;;  %p969_p10 = scmp.lt.u32.totalorder %s965_s10, %s1115_s7 }
 0x30c   :  { %p971_p11 = pnand %p969_p10, %p966_p9 }
 0x30e   :  { %974 = shalt.err (!%p971_p11)
}
 0x30f   :  { %670 = dma.vmem_to_hbm [thread:$0]  %s668_s30, 128, %s1115_s7, [#allocation4]  }
 0x310   :  { %981 = dma.done.wait [#allocation4], 128  }
 0x311   :  { %982 = vsyncadd [#allocation4], 4294967168 }
 0x312   :  { %674 = vsyncpa [#allocation3], 1 }
 0x313   :  { %675 = vsyncpa [#allocation6], 1 }
 0x314   :  { %676 = vsyncpa [#allocation9], 1 }
 0x315   :  { %677 = vsyncpa [#allocation4], 1 }

</bundles_post_ra>
